<compile_context>
chip_gen: v7x
topology: tpu7x:2x2x1
jax: 0.10.0
libtpu: 0.0.40
codegen_flags: <defaults>
</compile_context>

<pallas_src>
import functools

import jax
import jax.numpy as jnp
from jax.experimental import pallas as pl
from jax.experimental.pallas import tpu as pltpu

EPS = 1e-08
LANE = 128

_TARGET_BLOCK_BYTES = 2 << 20   # resident path: target bytes of y per grid step
_TILE_BUDGET_BYTES = 12 << 20   # tiled path: budget for 2x in + 2x out tiles


def _vmem_cap_bytes():
    """Usable scoped-VMEM cap for the current TPU generation."""
    try:
        cap = int(pltpu.get_tpu_info().vmem_capacity_bytes)
    except Exception:
        cap = 64 << 20  # conservative fallback: v7x per-TC VMEM
    # ~20% headroom for Mosaic-internal scratch; never request > 100 MiB.
    return min(100 << 20, (cap * 4) // 5)


# --------------------------------------------------------------------------
# Resident path: whole (TM, N, K) slab in VMEM, stats + normalize in one pass.
# --------------------------------------------------------------------------
def _gln_resident_kernel(y_ref, gamma_ref, beta_ref, o_ref, *, inv_count):
    # y_ref/o_ref: (TM, N, K); gamma_ref/beta_ref: (1, N, 1).
    yf = y_ref[...].astype(jnp.float32)               # single upcast, reused below

    # Per-batch-row stats, centered two-pass (slab already resident -> free).
    s = jnp.sum(jnp.sum(yf, axis=2, keepdims=True), axis=1, keepdims=True)
    mean = s * inv_count                               # (TM, 1, 1)
    d = yf - mean
    ss = jnp.sum(jnp.sum(d * d, axis=2, keepdims=True), axis=1, keepdims=True)
    var = ss * inv_count                               # (TM, 1, 1)
    inv_std = jax.lax.rsqrt(var + EPS)

    # Folded affine: o = (y - mean) * (gamma * inv_std) + beta, all in f32,
    # one cast at the store.
    a = gamma_ref[...].astype(jnp.float32) * inv_std   # (TM, N, 1)
    o_ref[...] = (d * a + beta_ref[...].astype(jnp.float32)).astype(o_ref.dtype)


def _gln_resident(y, gamma, beta, vmem_cap):
    M, N, K = y.shape
    itemsize = jnp.dtype(y.dtype).itemsize
    slab_bytes = N * K * itemsize
    # 2x double-buffered input + 2x output (native width) + f32 temporaries.
    per_row = 4 * slab_bytes + 2 * N * K * 4

    # Pack several batch rows per grid step so small slabs still issue
    # ~1-4 MiB DMAs.  Non-divisible M is fine: OOB rows of the tail block are
    # per-row independent garbage and their stores are clipped to bounds.
    tm = max(1, min(M,
                    _TARGET_BLOCK_BYTES // max(1, slab_bytes),
                    vmem_cap // per_row))

    vmem_limit = int(min(vmem_cap, max(32 << 20, tm * per_row + (2 << 20))))
    kernel = functools.partial(_gln_resident_kernel, inv_count=1.0 / float(N * K))

    return pl.pallas_call(
        kernel,
        out_shape=jax.ShapeDtypeStruct((M, N, K), y.dtype),
        grid=(pl.cdiv(M, tm),),
        in_specs=[
            pl.BlockSpec((tm, N, K), lambda m: (m, 0, 0)),
            pl.BlockSpec((1, N, 1), lambda m: (0, 0, 0)),
            pl.BlockSpec((1, N, 1), lambda m: (0, 0, 0)),
        ],
        out_specs=pl.BlockSpec((tm, N, K), lambda m: (m, 0, 0)),
        compiler_params=pltpu.CompilerParams(
            dimension_semantics=("parallel",),
            vmem_limit_bytes=vmem_limit,
        ),
        cost_estimate=pl.CostEstimate(
            flops=7 * M * N * K,
            transcendentals=M,
            bytes_accessed=2 * M * N * K * itemsize + 2 * N * 4,
        ),
    )(y, gamma, beta)


# --------------------------------------------------------------------------
# K-tiled two-phase path for slabs that do not fit in VMEM (needed on v7x).
# --------------------------------------------------------------------------
def _gln_stats_kernel(y_ref, s_ref, ss_ref, *, K, TK, need_mask):
    # y_ref: (N, TK) tile (batch dim squeezed); s_ref/ss_ref: (1, 1) resident.
    kt = pl.program_id(1)

    @pl.when(kt == 0)
    def _():
        s_ref[...] = jnp.zeros_like(s_ref)
        ss_ref[...] = jnp.zeros_like(ss_ref)

    yf = y_ref[...].astype(jnp.float32)
    if need_mask:  # mask the out-of-bounds tail columns of the last K-tile
        col = kt * TK + jax.lax.broadcasted_iota(jnp.int32, yf.shape, 1)
        yf = jnp.where(col < K, yf, 0.0)

    s_ref[...] += jnp.sum(yf)
    ss_ref[...] += jnp.sum(yf * yf)


def _gln_apply_kernel(y_ref, a_ref, b_ref, o_ref):
    # y_ref/o_ref: (N, TK); a_ref/b_ref: (N, 1) f32.  Tail columns of the last
    # tile compute garbage that is dropped by the bounds-clipped store.
    yf = y_ref[...].astype(jnp.float32)
    o_ref[...] = (yf * a_ref[...] + b_ref[...]).astype(o_ref.dtype)


def _gln_tiled(y, gamma, beta, tile_k, vmem_cap):
    M, N, K = y.shape
    itemsize = jnp.dtype(y.dtype).itemsize
    KT = pl.cdiv(K, tile_k)
    need_mask = (K % tile_k) != 0
    tile_bytes = N * tile_k * itemsize
    vmem_limit = int(min(vmem_cap, max(32 << 20, 6 * tile_bytes)))

    stats_kernel = functools.partial(
        _gln_stats_kernel, K=K, TK=tile_k, need_mask=need_mask)

    s, ss = pl.pallas_call(
        stats_kernel,
        out_shape=(jax.ShapeDtypeStruct((M, 1, 1), jnp.float32),
                   jax.ShapeDtypeStruct((M, 1, 1), jnp.float32)),
        grid=(M, KT),
        in_specs=[pl.BlockSpec((pl.Squeezed(), N, tile_k),
                               lambda m, kt: (m, 0, kt))],
        out_specs=(pl.BlockSpec((pl.Squeezed(), 1, 1), lambda m, kt: (m, 0, 0)),
                   pl.BlockSpec((pl.Squeezed(), 1, 1), lambda m, kt: (m, 0, 0))),
        compiler_params=pltpu.CompilerParams(
            dimension_semantics=("parallel", "arbitrary"),
            vmem_limit_bytes=vmem_limit,
        ),
        cost_estimate=pl.CostEstimate(
            flops=3 * M * N * K,
            transcendentals=0,
            bytes_accessed=M * N * K * itemsize + 2 * M * 4,
        ),
    )(y)

    # Fold stats into per-(batch, channel) affine on M*N elements (tiny).
    inv_count = 1.0 / float(N * K)
    mean = s * inv_count                                        # (M, 1, 1)
    var = jnp.maximum(ss * inv_count - mean * mean, 0.0)
    inv_std = jax.lax.rsqrt(var + EPS)
    a = gamma.astype(jnp.float32) * inv_std                     # (M, N, 1)
    b = beta.astype(jnp.float32) - mean * a                     # (M, N, 1)

    return pl.pallas_call(
        _gln_apply_kernel,
        out_shape=jax.ShapeDtypeStruct((M, N, K), y.dtype),
        grid=(M, KT),
        in_specs=[
            pl.BlockSpec((pl.Squeezed(), N, tile_k), lambda m, kt: (m, 0, kt)),
            pl.BlockSpec((pl.Squeezed(), N, 1), lambda m, kt: (m, 0, 0)),
            pl.BlockSpec((pl.Squeezed(), N, 1), lambda m, kt: (m, 0, 0)),
        ],
        out_specs=pl.BlockSpec((pl.Squeezed(), N, tile_k),
                               lambda m, kt: (m, 0, kt)),
        compiler_params=pltpu.CompilerParams(
            dimension_semantics=("parallel", "parallel"),
            vmem_limit_bytes=vmem_limit,
        ),
        cost_estimate=pl.CostEstimate(
            flops=2 * M * N * K,
            transcendentals=0,
            bytes_accessed=2 * M * N * K * itemsize + 2 * M * N * 4,
        ),
    )(y, a, b)


# --------------------------------------------------------------------------
# Public wrapper.
# --------------------------------------------------------------------------
def global_layer_norm(y, gamma, beta, *, force_tiled=False, tile_k=None):
    """y: [M, N, K]; gamma, beta: [1, N, 1].  Returns gLN(y): [M, N, K]."""
    M, N, K = y.shape
    itemsize = jnp.dtype(y.dtype).itemsize
    vmem_cap = _vmem_cap_bytes()
    slab_bytes = N * K * itemsize

    # Resident fast path whenever (2x in + 2x out + f32 temps) fits the cap.
    if not force_tiled and (4 * slab_bytes + 2 * N * K * 4) <= vmem_cap:
        return _gln_resident(y, gamma, beta, vmem_cap)

    # K-tiled two-phase path for slabs too large to keep resident.
    if tile_k is None:
        tile_k = max(LANE,
                     (_TILE_BUDGET_BYTES // (4 * N * itemsize)) // LANE * LANE)
        tile_k = min(tile_k, pl.cdiv(K, LANE) * LANE)
    return _gln_tiled(y, gamma, beta, tile_k, vmem_cap)


def reference_gln(y, gamma, beta):
    # Pure-JAX reference mirroring the PyTorch forward exactly.
    mean = jnp.mean(jnp.mean(y, axis=1, keepdims=True), axis=2, keepdims=True)
    var = jnp.mean(
        jnp.mean((y - mean) ** 2, axis=1, keepdims=True), axis=2, keepdims=True)
    return gamma * (y - mean) / jnp.power(var + EPS, 0.5) + beta


if __name__ == "__main__":
    key = jax.random.PRNGKey(0)
    k_main, k_y2, k_g2, k_b2 = jax.random.split(key, 4)

    # Primary shape: resident path, multiple batch rows packed per grid step,
    # K deliberately not lane-aligned (tail store is lane-masked, no padding).
    M, N, K = 2, 4, 16
    y = jax.random.normal(k_main, (M, N, K), dtype=jnp.float32)
    # Deterministic parameter init as in reset_parameters(): gamma=1, beta=0.
    gamma = jnp.ones((1, N, 1), dtype=jnp.float32)
    beta = jnp.zeros((1, N, 1), dtype=jnp.float32)

    out = jax.block_until_ready(global_layer_norm(y, gamma, beta))
    ref = reference_gln(y, gamma, beta)
    assert out.shape == (M, N, K)
    assert jnp.allclose(out, ref, atol=2e-5, rtol=2e-5), "resident path mismatch"

    # Also exercise the K-tiled two-phase path (forced) with a non-128-aligned
    # K so cross-tile accumulation and tail masking are both covered.
    M2, N2, K2 = 2, 6, 200
    y2 = jax.random.normal(k_y2, (M2, N2, K2), dtype=jnp.float32) * 0.5 + 0.25
    g2 = jax.random.normal(k_g2, (1, N2, 1), dtype=jnp.float32)
    b2 = jax.random.normal(k_b2, (1, N2, 1), dtype=jnp.float32)
    out2 = jax.block_until_ready(
        global_layer_norm(y2, g2, b2, force_tiled=True, tile_k=128))
    ref2 = reference_gln(y2, g2, b2)
    assert out2.shape == (M2, N2, K2)
    assert jnp.allclose(out2, ref2, atol=2e-5, rtol=2e-5), "tiled path mismatch"

    print("KERNEL_OK")
</pallas_src>

<mosaic_0001>
module attributes {stable_mosaic.version = 11 : i64} {
  func.func @_gln_resident_kernel(%arg0: i32, %arg1: memref<2x4x16xf32, #tpu.memory_space<vmem>>, %arg2: memref<1x4x1xf32, #tpu.memory_space<vmem>>, %arg3: memref<1x4x1xf32, #tpu.memory_space<vmem>>, %arg4: memref<2x4x16xf32, #tpu.memory_space<vmem>>) attributes {dimension_semantics = [#tpu.dimension_semantics<parallel>], iteration_bounds = array<i64: 1>, scalar_prefetch = 0 : i64, scratch_operands = 0 : i64, tpu.core_type = #tpu.core_type<tc>, window_params = [{transform_indices = @transform_0, window_bounds = array<i64: 2, 4, 16>}, {pipeline_mode = #tpu.pipeline_mode<synchronous>, transform_indices = @transform_1, window_bounds = array<i64: 1, 4, 1>}, {pipeline_mode = #tpu.pipeline_mode<synchronous>, transform_indices = @transform_2, window_bounds = array<i64: 1, 4, 1>}, {transform_indices = @transform_3, window_bounds = array<i64: 2, 4, 16>}]} {
    %c0 = arith.constant 0 : index
    %c0_0 = arith.constant 0 : index
    %c0_1 = arith.constant 0 : index
    %0 = vector.load %arg1[%c0, %c0_0, %c0_1] : memref<2x4x16xf32, #tpu.memory_space<vmem>>, vector<2x4x16xf32>
    %cst = arith.constant dense<0.000000e+00> : vector<2x4xf32>
    %1 = vector.multi_reduction <add>, %0, %cst [2] : vector<2x4x16xf32> to vector<2x4xf32>
    %2 = vector.shape_cast %1 : vector<2x4xf32> to vector<2x4x1xf32>
    %cst_2 = arith.constant dense<0.000000e+00> : vector<2x1xf32>
    %3 = vector.multi_reduction <add>, %2, %cst_2 [1] : vector<2x4x1xf32> to vector<2x1xf32>
    %4 = vector.shape_cast %3 : vector<2x1xf32> to vector<2x1x1xf32>
    %cst_3 = arith.constant 1.562500e-02 : f32
    %5 = vector.broadcast %cst_3 : f32 to vector<2x1x1xf32>
    %6 = arith.mulf %4, %5 : vector<2x1x1xf32>
    %7 = vector.broadcast %6 : vector<2x1x1xf32> to vector<2x4x16xf32>
    %8 = arith.subf %0, %7 : vector<2x4x16xf32>
    %9 = arith.mulf %8, %8 : vector<2x4x16xf32>
    %cst_4 = arith.constant dense<0.000000e+00> : vector<2x4xf32>
    %10 = vector.multi_reduction <add>, %9, %cst_4 [2] : vector<2x4x16xf32> to vector<2x4xf32>
    %11 = vector.shape_cast %10 : vector<2x4xf32> to vector<2x4x1xf32>
    %cst_5 = arith.constant dense<0.000000e+00> : vector<2x1xf32>
    %12 = vector.multi_reduction <add>, %11, %cst_5 [1] : vector<2x4x1xf32> to vector<2x1xf32>
    %13 = vector.shape_cast %12 : vector<2x1xf32> to vector<2x1x1xf32>
    %cst_6 = arith.constant 1.562500e-02 : f32
    %14 = vector.broadcast %cst_6 : f32 to vector<2x1x1xf32>
    %15 = arith.mulf %13, %14 : vector<2x1x1xf32>
    %cst_7 = arith.constant 9.99999993E-9 : f32
    %16 = vector.broadcast %cst_7 : f32 to vector<2x1x1xf32>
    %17 = arith.addf %15, %16 : vector<2x1x1xf32>
    %18 = math.rsqrt %17 : vector<2x1x1xf32>
    %c0_8 = arith.constant 0 : index
    %c0_9 = arith.constant 0 : index
    %c0_10 = arith.constant 0 : index
    %19 = vector.load %arg2[%c0_8, %c0_9, %c0_10] : memref<1x4x1xf32, #tpu.memory_space<vmem>>, vector<1x4x1xf32>
    %20 = vector.broadcast %19 : vector<1x4x1xf32> to vector<2x4x1xf32>
    %21 = vector.broadcast %18 : vector<2x1x1xf32> to vector<2x4x1xf32>
    %22 = arith.mulf %20, %21 : vector<2x4x1xf32>
    %23 = vector.broadcast %22 : vector<2x4x1xf32> to vector<2x4x16xf32>
    %24 = arith.mulf %8, %23 : vector<2x4x16xf32>
    %c0_11 = arith.constant 0 : index
    %c0_12 = arith.constant 0 : index
    %c0_13 = arith.constant 0 : index
    %25 = vector.load %arg3[%c0_11, %c0_12, %c0_13] : memref<1x4x1xf32, #tpu.memory_space<vmem>>, vector<1x4x1xf32>
    %26 = vector.broadcast %25 : vector<1x4x1xf32> to vector<2x4x16xf32>
    %27 = arith.addf %24, %26 : vector<2x4x16xf32>
    %c0_14 = arith.constant 0 : index
    %c0_15 = arith.constant 0 : index
    %c0_16 = arith.constant 0 : index
    %28 = vector.load %arg4[%c0_14, %c0_15, %c0_16] : memref<2x4x16xf32, #tpu.memory_space<vmem>>, vector<2x4x16xf32>
    tpu.vector_store %arg4[%c0_14, %c0_15, %c0_16], %27 {strides = array<i32>} : memref<2x4x16xf32, #tpu.memory_space<vmem>>, vector<2x4x16xf32>,
    return
  }
  func.func @transform_0(%arg0: i32) -> (i32, i32, i32) {
    %c0_i32 = arith.constant 0 : i32
    %c0_i32_0 = arith.constant 0 : i32
    %c0_i32_1 = arith.constant 0 : i32
    return %arg0, %c0_i32, %c0_i32_0 : i32, i32, i32
  }
  func.func @transform_1(%arg0: i32) -> (i32, i32, i32) {
    %c0_i32 = arith.constant 0 : i32
    %c0_i32_0 = arith.constant 0 : i32
    %c0_i32_1 = arith.constant 0 : i32
    %c0_i32_2 = arith.constant 0 : i32
    return %c0_i32, %c0_i32_0, %c0_i32_1 : i32, i32, i32
  }
  func.func @transform_2(%arg0: i32) -> (i32, i32, i32) {
    %c0_i32 = arith.constant 0 : i32
    %c0_i32_0 = arith.constant 0 : i32
    %c0_i32_1 = arith.constant 0 : i32
    %c0_i32_2 = arith.constant 0 : i32
    return %c0_i32, %c0_i32_0, %c0_i32_1 : i32, i32, i32
  }
  func.func @transform_3(%arg0: i32) -> (i32, i32, i32) {
    %c0_i32 = arith.constant 0 : i32
    %c0_i32_0 = arith.constant 0 : i32
    %c0_i32_1 = arith.constant 0 : i32
    return %arg0, %c0_i32, %c0_i32_0 : i32, i32, i32
  }
}

</mosaic_0001>

<bundles_post_ra>
// kernel: tpu_custom_call.1
= control target key start
LH: loop header
LB: loop body
LE: loop exit
PB: predicated region body
PF: predicated region fallthrough
CT: control target
= control target key end

     0   :  { %vm17_vm0 = vcmask 125952   ;;  %s204_s0 = inlined_call_operand.vmem [shape: f32[2,4,16], index: 0, kind: input, shape index: {}]   ;;  %s205_s1 = inlined_call_operand.vmem [shape: f32[1,4,1], index: 1, kind: input, shape index: {}]   ;;  %s206_s2 = inlined_call_operand.vmem [shape: f32[1,4,1], index: 2, kind: input, shape index: {}]   ;;  %s207_s3 = inlined_call_operand.hbm [shape: f32[2,4,16], index: 3, kind: output, shape index: {}]  }
   0x1   :  { %v15_v0 = vld [vmem:[%s204_s0] sm:$0xf]  ;;  %v16_v1 = vld [vmem:[%s204_s0 + $0x4] sm:$0xf] }
   0x2   :  { %v18_v2 = vsel %vm17_vm0, %v15_v0, 0.0 }
   0x3   :  { %8 = vsyncpa [#allocation3], 0  ;;  %19 = vadd.xlane.f32.xlu0 %v18_v2  ;;  %v21_v3 = vsel %vm17_vm0, %v16_v1, 0.0  ;;  %vm24_vm1 = vcmask 1043456   ;;  %v146_v28 = vmov 0   ;;  %s147_s19 = smov [#allocation2]  }
   0x4   :  { %116 = vset.pattern.permute.xlu0 %v146_v28  ;;  %117 = vset.pattern.permute.xlu1 %v146_v28  ;;  %v71_v49 = vld [vmem:[%s205_s1] sm:$0xf]  ;;  %s101_s20 = sshll.u32 %s147_s19, 4  ;;  %s102_s20 = int_to_ptr.vmem [resolvable:$true] %s101_s20 }
   0x5   :  { %v86_v54 = vld [vmem:[%s206_s2] sm:$0xf]  ;;  %s122_s1 = scalar_lea.vmem %s102_s20, 128  ;;  %p127_p1 = scmp.lt.s32.totalorder %s102_s20, %s102_s20 }
   0x6   :  { %p123_p0 = scmp.ne.s32.totalorder %s102_s20, %s122_s1  ;;  %p128_p2 = scmp.lt.s32.totalorder %s122_s1, %s122_s1 }
   0x7   :  { %22 = vadd.xlane.f32.xlu0 %v21_v3 }
   0x8   :  { %p129_p3 = por %p128_p2, %p127_p1 }
   0xa   :  { %p130_p4 = pnand %p129_p3, %p123_p0 }
  0x90   :  { %v20_v4 = vpop.xlane.xlu0 %19 }
  0x91   :  { %v25_v5 = vsel %vm24_vm1, %v20_v4, 0.0 }
  0x92   :  { %v26_v6 = vrot.slane %v25_v5, 4 }
  0x94   :  { %v27_v7 = vadd.f32 %v26_v6, %v25_v5  ;;  %v23_v8 = vpop.xlane.xlu0 %22 }
  0x95   :  { %v32_v9 = vsel %vm24_vm1, %v23_v8, 0.0 }
  0x96   :  { %v28_v10 = vrot.slane %v27_v7, 2  ;;  %v33_v11 = vrot.slane %v32_v9, 4 }
  0x98   :  { %v29_v12 = vadd.f32 %v28_v10, %v27_v7  ;;  %v34_v13 = vadd.f32 %v33_v11, %v32_v9 }
  0x9a   :  { %v30_v14 = vrot.slane %v29_v12, 1  ;;  %v35_v15 = vrot.slane %v34_v13, 2 }
  0x9c   :  { %v31_v16 = vadd.f32 %v30_v14, %v29_v12  ;;  %v36_v17 = vadd.f32 %v35_v15, %v34_v13 }
  0x9e   :  { %v37_v18 = vrot.slane %v36_v17, 1  ;;  %v39_v19 = vmul.f32 0.015625, %v31_v16 }
  0xa0   :  { %v38_v20 = vadd.f32 %v37_v18, %v36_v17  ;;  %v41_v21 = vsub.f32 %v15_v0, %v39_v19 }
  0xa2   :  { %v40_v22 = vmul.f32 0.015625, %v38_v20  ;;  %v43_v23 = vmul.f32 %v41_v21, %v41_v21 }
  0xa4   :  { %v45_v24 = vsel %vm17_vm0, %v43_v23, 0.0  ;;  %v42_v25 = vsub.f32 %v16_v1, %v40_v22 }
  0xa5   :  { %46 = vadd.xlane.f32.xlu1 %v45_v24 }
  0xa6   :  { %v44_v26 = vmul.f32 %v42_v25, %v42_v25 }
  0xa8   :  { %v48_v27 = vsel %vm17_vm0, %v44_v26, 0.0 }
  0xa9   :  { %49 = vadd.xlane.f32.xlu1 %v48_v27 }
 0x132   :  { %v47_v29 = vpop.xlane.xlu1 %46 }
 0x133   :  { %v51_v30 = vsel %vm24_vm1, %v47_v29, 0.0 }
 0x134   :  { %v52_v31 = vrot.slane %v51_v30, 4 }
 0x136   :  { %v53_v32 = vadd.f32 %v52_v31, %v51_v30  ;;  %v50_v33 = vpop.xlane.xlu1 %49 }
 0x137   :  { %v58_v34 = vsel %vm24_vm1, %v50_v33, 0.0 }
 0x138   :  { %v54_v35 = vrot.slane %v53_v32, 2  ;;  %v59_v36 = vrot.slane %v58_v34, 4 }
 0x13a   :  { %v55_v37 = vadd.f32 %v54_v35, %v53_v32  ;;  %v60_v38 = vadd.f32 %v59_v36, %v58_v34 }
 0x13c   :  { %v56_v39 = vrot.slane %v55_v37, 1  ;;  %v61_v40 = vrot.slane %v60_v38, 2 }
 0x13e   :  { %v57_v41 = vadd.f32 %v56_v39, %v55_v37  ;;  %v62_v42 = vadd.f32 %v61_v40, %v60_v38 }
 0x140   :  { %v65_v43 = vmul.f32 0.015625, %v57_v41  ;;  %v63_v44 = vrot.slane %v62_v42, 1 }
 0x142   :  { %v67_v45 = vadd.f32 1e-08, %v65_v43  ;;  %v64_v46 = vadd.f32 %v63_v44, %v62_v42 }
 0x144   :  { %118 = vrsqrt.f32 %v67_v45  ;;  %v66_v47 = vmul.f32 0.015625, %v64_v46 }
 0x146   :  { %v68_v48 = vadd.f32 1e-08, %v66_v47 }
 0x148   :  { %120 = vrsqrt.f32 %v68_v48 }
 0x14e   :  { %v119_v50 = vpop.eup %118 }
 0x14f   :  { %v72_v51 = vmul.f32 %v119_v50, %v71_v49 }
 0x151   :  { %76 = vperm.xlu0 %116, %v72_v51  }
 0x152   :  { %v121_v52 = vpop.eup %120 }
 0x153   :  { %v73_v53 = vmul.f32 %v121_v52, %v71_v49 }
 0x155   :  { %81 = vperm.xlu1 %117, %v73_v53  }
 0x159   :  { %89 = vperm.xlu1 %117, %v86_v54  }
 0x1d0   :  { %v77_v55 = vpop.permute.xlu0 %76 }
 0x1d1   :  { %v84_v57 = vmul.f32 %v77_v55, %v41_v21 }
 0x1d4   :  { %v82_v56 = vpop.permute.xlu1 %81 }
 0x1d5   :  { %v85_v58 = vmul.f32 %v82_v56, %v42_v25 }
 0x1d8   :  { %v90_v59 = vpop.permute.xlu1 %89 }
 0x1d9   :  { %v92_v60 = vadd.f32 %v90_v59, %v84_v57  ;;  %v93_v61 = vadd.f32 %v90_v59, %v85_v58 }
 0x1db   :  { %94 = vst.msk [vmem:[#allocation2] sm:$0xf] %vm17_vm0, %v92_v60  ;;  %95 = vst.msk [vmem:[#allocation2 + $0x4] sm:$0xf] %vm17_vm0, %v93_v61 }
 0x1dc   :  { %133 = shalt.err (!%p130_p4)
}
 0x1dd   :  { %s134_s22 = scalar_lea.hbm %s207_s3, 128 }
 0x1de   :  { %p135_p5 = scmp.ne.s32.totalorder %s207_s3, %s134_s22  ;;  %p138_p6 = scmp.lt.u32.totalorder %s134_s22, %s207_s3 }
 0x1e0   :  { %p140_p7 = pnand %p138_p6, %p135_p5 }
 0x1e2   :  { %143 = shalt.err (!%p140_p7)
}
 0x1e3   :  { %s148_s27 = smov 64   ;;  %s149_s28 = smov 4  }
 0x1e4   :  { %107 = dma.vmem_to_hbm [thread:$0]  %s102_s20, 128, %s207_s3, [#allocation3], %s148_s27, %s148_s27, %s149_s28  }
 0x1e5   :  { %144 = dma.done.wait [#allocation3], 128  }
 0x1e6   :  { %145 = vsyncadd [#allocation3], 4294967168 }
 0x1e7   :  { %111 = vsyncpa [#allocation3], 1 }

</bundles_post_ra>
